<compile_context>
chip_gen: v7x
topology: tpu7x:2x2x1
jax: 0.10.0
libtpu: 0.0.40
codegen_flags: <defaults>
</compile_context>

<pallas_src>
import jax
import jax.numpy as jnp
from jax import lax
from jax.experimental import pallas as pl
from jax.experimental.pallas import tpu as pltpu  # noqa: F401

BN_EPS = 1e-5


# ---------------------------------------------------------------------------
# Single fused kernel: projections + block-diagonal attention (rank-1 form)
# + 1x1 output conv + BatchNorm1d (training-mode batch stats) + residual.
# ---------------------------------------------------------------------------
def _make_fused_kernel(B, P, C, IC):
    BP = B * P
    inv_p = 1.0 / float(P)
    inv_n = 1.0 / float(BP)

    def kernel(x_ref, kv_ref, wq_ref, wkv_ref, bproj_ref, wout_ref, cvec_ref, out_ref):
        x2 = x_ref[...]                      # (BP, C)  query source (points x channels)
        kv2 = kv_ref[...]                    # (BP, C)  key/value source (batch-rolled x)
        bp = bproj_ref[...]                  # (1, 3*IC) biases: [theta | phi | g]

        # ---- fused 1x1-conv projections (channel matmuls over the whole batch) ----
        q = jnp.dot(x2, wq_ref[...], preferred_element_type=jnp.float32) + bp[:, :IC]       # (BP, IC)
        kvp = jnp.dot(kv2, wkv_ref[...], preferred_element_type=jnp.float32) + bp[:, IC:]   # (BP, 2IC)
        k = kvp[:, :IC]                                                                     # phi(kv)
        v = kvp[:, IC:]                                                                     # g(kv)

        # ---- per-sample attention scores in one MXU pass, block-diagonal mask ----
        s = lax.dot_general(q, k, (((1,), (1,)), ((), ())),
                            preferred_element_type=jnp.float32)                             # (BP, BP)

        # one-hot sample membership: onehot[g, b] = 1 iff row g belongs to sample b
        gi = lax.broadcasted_iota(jnp.int32, (BP, B), 0)
        bi = lax.broadcasted_iota(jnp.int32, (BP, B), 1)
        dg = gi - bi * P
        onehot = ((dg >= 0) & (dg < P)).astype(jnp.float32)                                 # (BP, B)

        # mask[i, j] = 1 iff rows i and j belong to the same sample (MXU, no int div)
        maskf = lax.dot_general(onehot, onehot, (((1,), (1,)), ((), ())),
                                preferred_element_type=jnp.float32)                         # (BP, BP)
        s = s + (maskf - 1.0) * 1e30          # cross-sample pairs -> ~-1e30 -> exp == 0

        # softmax over keys; divide lives on the EUP (approx reciprocal + Newton)
        s = s - jnp.max(s, axis=-1, keepdims=True)
        e = jnp.exp(s)
        d = jnp.sum(e, axis=-1, keepdims=True)                                              # (BP, 1)
        r = pl.reciprocal(d, approx=True)
        r = r * (2.0 - d * r)                 # Newton refinement -> f32-accurate 1/d
        r = r * (2.0 - d * r)

        # ---- rank-1 rewrite of fg/bg attention ----
        # fg_attention[j, :] is constant over its last dim and equals
        #   mean_i softmax(s)[i, j] = sum_i e[i, j] * (r[i] / P)
        fg = lax.dot_general(e, r * inv_p, (((0,), (0,)), ((), ())),
                             preferred_element_type=jnp.float32)                            # (BP, 1)

        # per-sample sum of value rows, via the one-hot matrix (stays on the MXU)
        vsum = lax.dot_general(onehot, v, (((0,), (0,)), ((), ())),
                               preferred_element_type=jnp.float32)                          # (B, IC)

        wout = wout_ref[...]                  # (2IC, C): rows [W_bg^T ; W_fg^T - W_bg^T]
        cv = cvec_ref[...]                    # (3, C):   rows [W_b ; bn_gamma ; bn_beta]
        base = jnp.dot(vsum, wout[:IC], preferred_element_type=jnp.float32) + cv[0:1]       # (B, C)
        diff = jnp.dot(vsum, wout[IC:], preferred_element_type=jnp.float32)                 # (B, C)

        # scatter per-sample rows back to all BP points:  wy[g] = base[b(g)] + fg[g]*diff[b(g)]
        wy = (jnp.dot(onehot, base, preferred_element_type=jnp.float32)
              + jnp.dot(fg * onehot, diff, preferred_element_type=jnp.float32))             # (BP, C)

        # ---- BatchNorm1d (training mode, biased var), one-pass stats, + residual ----
        mean = jnp.sum(wy, axis=0, keepdims=True) * inv_n                                   # (1, C)
        msq = jnp.sum(wy * wy, axis=0, keepdims=True) * inv_n
        var = msq - mean * mean
        norm = (wy - mean) * lax.rsqrt(var + BN_EPS)
        out_ref[...] = cv[1:2] * norm + cv[2:3] + x2

    return kernel


# ---------------------------------------------------------------------------
# Wrapper
# ---------------------------------------------------------------------------
def nonlocal_block_1d_mutual(x, params):
    """x: (B, C, P) float32 -> (B, C, P) float32."""
    B, C, P = x.shape
    IC = params["g_w"].shape[0]

    # key/value source: batch-rolled x  ([x[-1], x[0], ..., x[B-2]])
    kv_src = jnp.concatenate([x[-1:], x[:-1]], axis=0)

    # layout glue: (B, C, P) -> (B*P, C)  (points on sublanes, channels on lanes)
    x2 = jnp.transpose(x, (0, 2, 1)).reshape(B * P, C).astype(jnp.float32)
    kv2 = jnp.transpose(kv_src, (0, 2, 1)).reshape(B * P, C).astype(jnp.float32)

    # consolidated parameters (5 arrays instead of 11)
    wq = params["theta_w"].T.astype(jnp.float32)                                   # (C, IC)
    wkv = jnp.concatenate([params["phi_w"].T, params["g_w"].T],
                          axis=1).astype(jnp.float32)                              # (C, 2IC) [phi | g]
    bproj = jnp.concatenate([params["theta_b"], params["phi_b"],
                             params["g_b"]]).reshape(1, 3 * IC).astype(jnp.float32)
    wwT = params["W_w"].T.astype(jnp.float32)                                      # (2IC, C) = [W_fg^T ; W_bg^T]
    w_bg = wwT[IC:]
    w_diff = wwT[:IC] - w_bg
    wout = jnp.concatenate([w_bg, w_diff], axis=0)                                 # (2IC, C)
    cvec = jnp.stack([params["W_b"], params["bn_gamma"],
                      params["bn_beta"]], axis=0).astype(jnp.float32)              # (3, C)

    kernel = _make_fused_kernel(B, P, C, IC)
    out2 = pl.pallas_call(
        kernel,
        out_shape=jax.ShapeDtypeStruct((B * P, C), jnp.float32),
    )(x2, kv2, wq, wkv, bproj, wout, cvec)

    return jnp.transpose(out2.reshape(B, P, C), (0, 2, 1))


# ---------------------------------------------------------------------------
# Pure-JAX reference mirroring the PyTorch forward (for validation)
# ---------------------------------------------------------------------------
def reference(x, params):
    B, C, P = x.shape
    IC = params["g_w"].shape[0]
    kv_src = jnp.concatenate([x[-1:], x[:-1]], axis=0)

    def conv1x1(inp, w, b):  # inp (B, Cin, P), w (Cout, Cin), b (Cout,)
        return jnp.einsum("oc,bcp->bop", w, inp) + b[None, :, None]

    value = jnp.transpose(conv1x1(kv_src, params["g_w"], params["g_b"]), (0, 2, 1))      # (B,P,IC)
    query = jnp.transpose(conv1x1(x, params["theta_w"], params["theta_b"]), (0, 2, 1))   # (B,P,IC)
    key = conv1x1(kv_src, params["phi_w"], params["phi_b"])                              # (B,IC,P)

    f = jnp.einsum("bpi,biq->bpq", query, key)
    f = jax.nn.softmax(f, axis=-1)
    fg = jnp.broadcast_to(jnp.mean(f, axis=1)[:, :, None], (B, P, P))
    bg = 1.0 - fg
    fg_feat = jnp.einsum("bpq,bqi->bpi", fg, value)
    bg_feat = jnp.einsum("bpq,bqi->bpi", bg, value)
    y = jnp.transpose(jnp.concatenate([fg_feat, bg_feat], axis=2), (0, 2, 1))            # (B,2IC,P)

    wy = conv1x1(y, params["W_w"], params["W_b"])                                        # (B,C,P)
    mean = jnp.mean(wy, axis=(0, 2), keepdims=True)
    var = jnp.mean((wy - mean) ** 2, axis=(0, 2), keepdims=True)
    wy_bn = (params["bn_gamma"][None, :, None] * (wy - mean) * lax.rsqrt(var + BN_EPS)
             + params["bn_beta"][None, :, None])
    return wy_bn + x


if __name__ == "__main__":
    B, C, P = 4, 8, 16          # batch, in_channels, n_points
    IC = C // 2                 # inter_channels

    key = jax.random.PRNGKey(0)
    ks = jax.random.split(key, 12)
    x = jax.random.normal(ks[0], (B, C, P), dtype=jnp.float32)

    params = {
        "g_w":     0.1 * jax.random.normal(ks[1], (IC, C), dtype=jnp.float32),
        "g_b":     0.1 * jax.random.normal(ks[2], (IC,), dtype=jnp.float32),
        "theta_w": 0.1 * jax.random.normal(ks[3], (IC, C), dtype=jnp.float32),
        "theta_b": 0.1 * jax.random.normal(ks[4], (IC,), dtype=jnp.float32),
        "phi_w":   0.1 * jax.random.normal(ks[5], (IC, C), dtype=jnp.float32),
        "phi_b":   0.1 * jax.random.normal(ks[6], (IC,), dtype=jnp.float32),
        "W_w":     0.1 * jax.random.normal(ks[7], (C, 2 * IC), dtype=jnp.float32),
        "W_b":     0.1 * jax.random.normal(ks[8], (C,), dtype=jnp.float32),
        # PyTorch __init__ zero-inits these (making z == x); use nonzero values here.
        "bn_gamma": 1.0 + 0.1 * jax.random.normal(ks[9], (C,), dtype=jnp.float32),
        "bn_beta":  0.1 * jax.random.normal(ks[10], (C,), dtype=jnp.float32),
    }

    z = nonlocal_block_1d_mutual(x, params)
    z = jax.block_until_ready(z)

    z_ref = reference(x, params)
    assert z.shape == x.shape == z_ref.shape
    max_err = float(jnp.max(jnp.abs(z - z_ref)))
    if not bool(jnp.allclose(z, z_ref, atol=2e-4, rtol=2e-4)):
        raise AssertionError(f"Pallas result mismatch vs reference, max abs err = {max_err}")
    print("KERNEL_OK")
</pallas_src>

<mosaic_0001>
module attributes {stable_mosaic.version = 11 : i64} {
  func.func @kernel(%arg0: memref<64x8xf32, #tpu.memory_space<vmem>>, %arg1: memref<64x8xf32, #tpu.memory_space<vmem>>, %arg2: memref<8x4xf32, #tpu.memory_space<vmem>>, %arg3: memref<8x8xf32, #tpu.memory_space<vmem>>, %arg4: memref<1x12xf32, #tpu.memory_space<vmem>>, %arg5: memref<8x8xf32, #tpu.memory_space<vmem>>, %arg6: memref<3x8xf32, #tpu.memory_space<vmem>>, %arg7: memref<64x8xf32, #tpu.memory_space<vmem>>) attributes {dimension_semantics = [], scalar_prefetch = 0 : i64, scratch_operands = 0 : i64, tpu.core_type = #tpu.core_type<tc>} {
    %c0 = arith.constant 0 : index
    %c0_0 = arith.constant 0 : index
    %0 = vector.load %arg0[%c0, %c0_0] : memref<64x8xf32, #tpu.memory_space<vmem>>, vector<64x8xf32>
    %c0_1 = arith.constant 0 : index
    %c0_2 = arith.constant 0 : index
    %1 = vector.load %arg1[%c0_1, %c0_2] : memref<64x8xf32, #tpu.memory_space<vmem>>, vector<64x8xf32>
    %c0_3 = arith.constant 0 : index
    %c0_4 = arith.constant 0 : index
    %2 = vector.load %arg4[%c0_3, %c0_4] : memref<1x12xf32, #tpu.memory_space<vmem>>, vector<1x12xf32>
    %c0_5 = arith.constant 0 : index
    %c0_6 = arith.constant 0 : index
    %3 = vector.load %arg2[%c0_5, %c0_6] : memref<8x4xf32, #tpu.memory_space<vmem>>, vector<8x4xf32>
    %cst = arith.constant dense<0.000000e+00> : vector<64x4xf32>
    %4 = tpu.matmul %0, %3, %cst {dimension_numbers = #tpu.dot_dimension_numbers<[1], [0], [0], [1], [0, 0, 1, 1], [], []>} : vector<64x8xf32>, vector<8x4xf32>, vector<64x4xf32> -> vector<64x4xf32>
    %5 = vector.extract_strided_slice %2 {offsets = [0, 0], sizes = [1, 4], strides = [1, 1]} : vector<1x12xf32> to vector<1x4xf32>
    %6 = vector.broadcast %5 : vector<1x4xf32> to vector<64x4xf32>
    %7 = arith.addf %4, %6 : vector<64x4xf32>
    %c0_7 = arith.constant 0 : index
    %c0_8 = arith.constant 0 : index
    %8 = vector.load %arg3[%c0_7, %c0_8] : memref<8x8xf32, #tpu.memory_space<vmem>>, vector<8x8xf32>
    %cst_9 = arith.constant dense<0.000000e+00> : vector<64x8xf32>
    %9 = tpu.matmul %1, %8, %cst_9 {dimension_numbers = #tpu.dot_dimension_numbers<[1], [0], [0], [1], [0, 0, 1, 1], [], []>} : vector<64x8xf32>, vector<8x8xf32>, vector<64x8xf32> -> vector<64x8xf32>
    %10 = vector.extract_strided_slice %2 {offsets = [0, 4], sizes = [1, 8], strides = [1, 1]} : vector<1x12xf32> to vector<1x8xf32>
    %11 = vector.broadcast %10 : vector<1x8xf32> to vector<64x8xf32>
    %12 = arith.addf %9, %11 : vector<64x8xf32>
    %13 = vector.extract_strided_slice %12 {offsets = [0, 0], sizes = [64, 4], strides = [1, 1]} : vector<64x8xf32> to vector<64x4xf32>
    %14 = vector.extract_strided_slice %12 {offsets = [0, 4], sizes = [64, 4], strides = [1, 1]} : vector<64x8xf32> to vector<64x4xf32>
    %cst_10 = arith.constant dense<0.000000e+00> : vector<64x64xf32>
    %15 = tpu.matmul %7, %13, %cst_10 {dimension_numbers = #tpu.dot_dimension_numbers<[1], [1], [0], [0], [0, 0, 1, 0], [], []>} : vector<64x4xf32>, vector<64x4xf32>, vector<64x64xf32> -> vector<64x64xf32>
    %16 = tpu.iota {dimensions = array<i32: 0>} : vector<64x4xi32>
    %17 = tpu.iota {dimensions = array<i32: 1>} : vector<64x4xi32>
    %c16_i32 = arith.constant 16 : i32
    %18 = vector.broadcast %c16_i32 : i32 to vector<64x4xi32>
    %19 = arith.muli %17, %18 : vector<64x4xi32>
    %20 = arith.subi %16, %19 : vector<64x4xi32>
    %c0_i32 = arith.constant 0 : i32
    %21 = vector.broadcast %c0_i32 : i32 to vector<64x4xi32>
    %22 = arith.cmpi sge, %20, %21 : vector<64x4xi32>
    %c16_i32_11 = arith.constant 16 : i32
    %23 = vector.broadcast %c16_i32_11 : i32 to vector<64x4xi32>
    %24 = arith.cmpi slt, %20, %23 : vector<64x4xi32>
    %25 = arith.andi %22, %24 : vector<64x4xi1>
    %26 = arith.extui %25 : vector<64x4xi1> to vector<64x4xi32>
    %27 = arith.sitofp %26 : vector<64x4xi32> to vector<64x4xf32>
    %cst_12 = arith.constant dense<0.000000e+00> : vector<64x64xf32>
    %28 = tpu.matmul %27, %27, %cst_12 {dimension_numbers = #tpu.dot_dimension_numbers<[1], [1], [0], [0], [0, 0, 1, 0], [], []>} : vector<64x4xf32>, vector<64x4xf32>, vector<64x64xf32> -> vector<64x64xf32>
    %cst_13 = arith.constant 1.000000e+00 : f32
    %29 = vector.broadcast %cst_13 : f32 to vector<64x64xf32>
    %30 = arith.subf %28, %29 : vector<64x64xf32>
    %cst_14 = arith.constant 1.000000e+30 : f32
    %31 = vector.broadcast %cst_14 : f32 to vector<64x64xf32>
    %32 = arith.mulf %30, %31 : vector<64x64xf32>
    %33 = arith.addf %15, %32 : vector<64x64xf32>
    %cst_15 = arith.constant dense<0xFF800000> : vector<64xf32>
    %34 = vector.multi_reduction <maximumf>, %33, %cst_15 [1] : vector<64x64xf32> to vector<64xf32>
    %35 = vector.shape_cast %34 : vector<64xf32> to vector<64x1xf32>
    %36 = vector.broadcast %35 : vector<64x1xf32> to vector<64x64xf32>
    %37 = arith.subf %33, %36 : vector<64x64xf32>
    %38 = math.exp %37 : vector<64x64xf32>
    %cst_16 = arith.constant dense<0.000000e+00> : vector<64xf32>
    %39 = vector.multi_reduction <add>, %38, %cst_16 [1] : vector<64x64xf32> to vector<64xf32>
    %40 = vector.shape_cast %39 : vector<64xf32> to vector<64x1xf32>
    %41 = tpu.reciprocal %40 {approx = true} : vector<64x1xf32> -> vector<64x1xf32>
    %42 = arith.mulf %40, %41 : vector<64x1xf32>
    %cst_17 = arith.constant 2.000000e+00 : f32
    %43 = vector.broadcast %cst_17 : f32 to vector<64x1xf32>
    %44 = arith.subf %43, %42 : vector<64x1xf32>
    %45 = arith.mulf %41, %44 : vector<64x1xf32>
    %46 = arith.mulf %40, %45 : vector<64x1xf32>
    %cst_18 = arith.constant 2.000000e+00 : f32
    %47 = vector.broadcast %cst_18 : f32 to vector<64x1xf32>
    %48 = arith.subf %47, %46 : vector<64x1xf32>
    %49 = arith.mulf %45, %48 : vector<64x1xf32>
    %cst_19 = arith.constant 6.250000e-02 : f32
    %50 = vector.broadcast %cst_19 : f32 to vector<64x1xf32>
    %51 = arith.mulf %49, %50 : vector<64x1xf32>
    %cst_20 = arith.constant dense<0.000000e+00> : vector<64x1xf32>
    %52 = tpu.matmul %38, %51, %cst_20 {dimension_numbers = #tpu.dot_dimension_numbers<[0], [0], [1], [1], [0, 1, 1, 1], [], []>} : vector<64x64xf32>, vector<64x1xf32>, vector<64x1xf32> -> vector<64x1xf32>
    %cst_21 = arith.constant dense<0.000000e+00> : vector<4x4xf32>
    %53 = tpu.matmul %27, %14, %cst_21 {dimension_numbers = #tpu.dot_dimension_numbers<[0], [0], [1], [1], [0, 1, 1, 1], [], []>} : vector<64x4xf32>, vector<64x4xf32>, vector<4x4xf32> -> vector<4x4xf32>
    %c0_22 = arith.constant 0 : index
    %c0_23 = arith.constant 0 : index
    %54 = vector.load %arg5[%c0_22, %c0_23] : memref<8x8xf32, #tpu.memory_space<vmem>>, vector<8x8xf32>
    %c0_24 = arith.constant 0 : index
    %c0_25 = arith.constant 0 : index
    %55 = vector.load %arg6[%c0_24, %c0_25] : memref<3x8xf32, #tpu.memory_space<vmem>>, vector<3x8xf32>
    %56 = vector.extract_strided_slice %54 {offsets = [0, 0], sizes = [4, 8], strides = [1, 1]} : vector<8x8xf32> to vector<4x8xf32>
    %cst_26 = arith.constant dense<0.000000e+00> : vector<4x8xf32>
    %57 = tpu.matmul %53, %56, %cst_26 {dimension_numbers = #tpu.dot_dimension_numbers<[1], [0], [0], [1], [0, 0, 1, 1], [], []>} : vector<4x4xf32>, vector<4x8xf32>, vector<4x8xf32> -> vector<4x8xf32>
    %58 = vector.extract_strided_slice %55 {offsets = [0, 0], sizes = [1, 8], strides = [1, 1]} : vector<3x8xf32> to vector<1x8xf32>
    %59 = vector.broadcast %58 : vector<1x8xf32> to vector<4x8xf32>
    %60 = arith.addf %57, %59 : vector<4x8xf32>
    %61 = vector.extract_strided_slice %54 {offsets = [4, 0], sizes = [4, 8], strides = [1, 1]} : vector<8x8xf32> to vector<4x8xf32>
    %cst_27 = arith.constant dense<0.000000e+00> : vector<4x8xf32>
    %62 = tpu.matmul %53, %61, %cst_27 {dimension_numbers = #tpu.dot_dimension_numbers<[1], [0], [0], [1], [0, 0, 1, 1], [], []>} : vector<4x4xf32>, vector<4x8xf32>, vector<4x8xf32> -> vector<4x8xf32>
    %cst_28 = arith.constant dense<0.000000e+00> : vector<64x8xf32>
    %63 = tpu.matmul %27, %60, %cst_28 {dimension_numbers = #tpu.dot_dimension_numbers<[1], [0], [0], [1], [0, 0, 1, 1], [], []>} : vector<64x4xf32>, vector<4x8xf32>, vector<64x8xf32> -> vector<64x8xf32>
    %64 = vector.broadcast %52 : vector<64x1xf32> to vector<64x4xf32>
    %65 = arith.mulf %64, %27 : vector<64x4xf32>
    %cst_29 = arith.constant dense<0.000000e+00> : vector<64x8xf32>
    %66 = tpu.matmul %65, %62, %cst_29 {dimension_numbers = #tpu.dot_dimension_numbers<[1], [0], [0], [1], [0, 0, 1, 1], [], []>} : vector<64x4xf32>, vector<4x8xf32>, vector<64x8xf32> -> vector<64x8xf32>
    %67 = arith.addf %63, %66 : vector<64x8xf32>
    %cst_30 = arith.constant dense<0.000000e+00> : vector<8xf32>
    %68 = vector.multi_reduction <add>, %67, %cst_30 [0] : vector<64x8xf32> to vector<8xf32>
    %69 = vector.shape_cast %68 : vector<8xf32> to vector<1x8xf32>
    %cst_31 = arith.constant 1.562500e-02 : f32
    %70 = vector.broadcast %cst_31 : f32 to vector<1x8xf32>
    %71 = arith.mulf %69, %70 : vector<1x8xf32>
    %72 = arith.mulf %67, %67 : vector<64x8xf32>
    %cst_32 = arith.constant dense<0.000000e+00> : vector<8xf32>
    %73 = vector.multi_reduction <add>, %72, %cst_32 [0] : vector<64x8xf32> to vector<8xf32>
    %74 = vector.shape_cast %73 : vector<8xf32> to vector<1x8xf32>
    %cst_33 = arith.constant 1.562500e-02 : f32
    %75 = vector.broadcast %cst_33 : f32 to vector<1x8xf32>
    %76 = arith.mulf %74, %75 : vector<1x8xf32>
    %77 = arith.mulf %71, %71 : vector<1x8xf32>
    %78 = arith.subf %76, %77 : vector<1x8xf32>
    %79 = vector.broadcast %71 : vector<1x8xf32> to vector<64x8xf32>
    %80 = arith.subf %67, %79 : vector<64x8xf32>
    %cst_34 = arith.constant 9.99999974E-6 : f32
    %81 = vector.broadcast %cst_34 : f32 to vector<1x8xf32>
    %82 = arith.addf %78, %81 : vector<1x8xf32>
    %83 = math.rsqrt %82 : vector<1x8xf32>
    %84 = vector.broadcast %83 : vector<1x8xf32> to vector<64x8xf32>
    %85 = arith.mulf %80, %84 : vector<64x8xf32>
    %86 = vector.extract_strided_slice %55 {offsets = [1, 0], sizes = [1, 8], strides = [1, 1]} : vector<3x8xf32> to vector<1x8xf32>
    %87 = vector.broadcast %86 : vector<1x8xf32> to vector<64x8xf32>
    %88 = arith.mulf %87, %85 : vector<64x8xf32>
    %89 = vector.extract_strided_slice %55 {offsets = [2, 0], sizes = [1, 8], strides = [1, 1]} : vector<3x8xf32> to vector<1x8xf32>
    %90 = vector.broadcast %89 : vector<1x8xf32> to vector<64x8xf32>
    %91 = arith.addf %88, %90 : vector<64x8xf32>
    %92 = arith.addf %91, %0 : vector<64x8xf32>
    %c0_35 = arith.constant 0 : index
    %c0_36 = arith.constant 0 : index
    %93 = vector.load %arg7[%c0_35, %c0_36] : memref<64x8xf32, #tpu.memory_space<vmem>>, vector<64x8xf32>
    tpu.vector_store %arg7[%c0_35, %c0_36], %92 {strides = array<i32>} : memref<64x8xf32, #tpu.memory_space<vmem>>, vector<64x8xf32>,
    return
  }
}

</mosaic_0001>

<bundles_post_ra>
// kernel: tpu_custom_call.1
= control target key start
LH: loop header
LB: loop body
LE: loop exit
PB: predicated region body
PF: predicated region fallthrough
CT: control target
= control target key end

     0   :  { %vm50_vm0 = vcmask 64512   ;;  %v313_v19 = vlaneseq  ;;  %v2175_v26 = vmov 0.0   ;;  %vm373_vm7 = vcmask 31744   ;;  %s2613_s3 = inlined_call_operand.vmem [shape: f32[8,8], index: 3, kind: input, shape index: {}]   ;;  %s2614_s1 = inlined_call_operand.vmem [shape: f32[64,8], index: 1, kind: input, shape index: {}]   ;;  %s2615_s2 = inlined_call_operand.vmem [shape: f32[8,4], index: 2, kind: input, shape index: {}]   ;;  %s2616_s0 = inlined_call_operand.vmem [shape: f32[64,8], index: 0, kind: input, shape index: {}]   ;;  %s2617_s4 = inlined_call_operand.vmem [shape: f32[1,12], index: 4, kind: input, shape index: {}]   ;;  %s2618_s5 = inlined_call_operand.vmem [shape: f32[8,8], index: 5, kind: input, shape index: {}]   ;;  %s2619_s6 = inlined_call_operand.vmem [shape: f32[3,8], index: 6, kind: input, shape index: {}]   ;;  %s2620_s7 = inlined_call_operand.vmem [shape: f32[64,8], index: 7, kind: output, shape index: {}]  }
   0x1   :  { %v180_v0 = vld [vmem:[%s2613_s3] sm:$0xff]  ;;  %v35_v2 = vld [vmem:[%s2614_s1 + $0x8] sm:$0xff]  ;;  %v36_v3 = vld [vmem:[%s2614_s1 + $0x10] sm:$0xff] }
   0x2   :  { %v34_v1 = vld [vmem:[%s2614_s1] sm:$0xff]  ;;  %1866 = vmatprep.subr.mxu1 %v180_v0  ;;  %v27_v6 = vld [vmem:[%s2616_s0 + $0x8] sm:$0xff]  ;;  %v37_v7 = vld [vmem:[%s2614_s1 + $0x18] sm:$0xff]  ;;  %v2296_v20 = vshrl.u32 %v313_v19, 7  ;;  %v323_v21 = vand.u32 127, %v313_v19 }
   0x3   :  { %1868 = vmatprep.mubr.msk.f32.mxu1 %vm50_vm0, %v34_v1  ;;  %1867 = vmatpush3.msra.mxu1 %v180_v0  ;;  %v43_v4 = vld [vmem:[%s2615_s2] sm:$0xff]  ;;  %v28_v8 = vld [vmem:[%s2616_s0 + $0x10] sm:$0xff]  ;;  %v29_v11 = vld [vmem:[%s2616_s0 + $0x18] sm:$0xff] }
   0x4   :  { %1869 = vmatmul.mubr.msk.f32.vlgmr.msra.gmra.mrb[0].mxu1 %vm50_vm0, %v35_v2  ;;  %v26_v5 = vld [vmem:[%s2616_s0] sm:$0xff]  ;;  %1852 = vmatprep.subr.mxu0 %v43_v4  ;;  %v39_v12 = vld [vmem:[%s2614_s1 + $0x28] sm:$0xff]  ;;  %v40_v14 = vld [vmem:[%s2614_s1 + $0x30] sm:$0xff]  ;;  %v315_v22 = vadd.s32 8, %v2296_v20  ;;  %v324_v23 = vmul.u32 16, %v323_v21  ;;  %v316_v31 = vadd.s32 16, %v2296_v20 }
   0x5   :  { %1871 = vmatprep.mubr.msk.f32.mxu1 %vm50_vm0, %v36_v3  ;;  %v38_v9 = vld [vmem:[%s2614_s1 + $0x20] sm:$0xff]  ;;  %1853 = vmatpush3.msra.mxu0 %v43_v4  ;;  %v31_v15 = vld [vmem:[%s2616_s0 + $0x28] sm:$0xff]  ;;  %v41_v16 = vld [vmem:[%s2614_s1 + $0x38] sm:$0xff]  ;;  %v317_v32 = vadd.s32 24, %v2296_v20  ;;  %v318_v38 = vadd.s32 32, %v2296_v20  ;;  %v319_v39 = vadd.s32 40, %v2296_v20 }
   0x6   :  { %1854 = vmatprep.mubr.msk.f32.mxu0 %vm50_vm0, %v26_v5  ;;  %v2257_v10 = vld [vmem:[%s2617_s4] ss:$0 sm:$0xff]  ;;  %s2174_s4 = smov 124   ;;  %v32_v17 = vld [vmem:[%s2616_s0 + $0x30] sm:$0xff]  ;;  %v33_v18 = vld [vmem:[%s2616_s0 + $0x38] sm:$0xff]  ;;  %v325_v24 = vsub.s32 %v2296_v20, %v324_v23  ;;  %v326_v25 = vsub.s32 %v315_v22, %v324_v23  ;;  %v327_v33 = vsub.s32 %v316_v31, %v324_v23  ;;  %v320_v45 = vadd.s32 48, %v2296_v20 }
   0x7   :  { %1855 = vmatmul.mubr.msk.f32.vlgmr.msra.gmra.mrb[0].mxu0 %vm50_vm0, %v27_v6  ;;  %v30_v13 = vld [vmem:[%s2616_s0 + $0x20] sm:$0xff]  ;;  %181 = vrot.lane.b32.xlu0 %v2257_v10, %s2174_s4  ;;  %vm2310_vm8 = vmpackc.low %vm373_vm7, %vm373_vm7  ;;  %v328_v34 = vsub.s32 %v317_v32, %v324_v23  ;;  %v329_v40 = vsub.s32 %v318_v38, %v324_v23  ;;  %v330_v41 = vsub.s32 %v319_v39, %v324_v23  ;;  %v321_v46 = vadd.s32 56, %v2296_v20 }
   0x8   :  { %1872 = vmatmul.mubr.msk.f32.gmra.mrb[2].mxu1 %vm50_vm0, %v37_v7  ;;  %1857 = vmatprep.mubr.msk.f32.mxu0 %vm50_vm0, %v28_v8  ;;  %vm333_vm1 = vcmp.ge.s32.totalorder %v325_v24, 0  ;;  %vm334_vm2 = vcmp.ge.s32.totalorder %v326_v25, 0  ;;  %vm341_vm3 = vcmp.lt.s32.totalorder %v325_v24, 16  ;;  %vm342_vm4 = vcmp.lt.s32.totalorder %v326_v25, 16 }
   0x9   :  { %1874 = vmatprep.mubr.msk.f32.mxu1 %vm50_vm0, %v38_v9  ;;  %vm349_vm5 = vmand %vm333_vm1, %vm341_vm3  ;;  %vm335_vm9 = vcmp.ge.s32.totalorder %v327_v33, 0  ;;  %vm336_vm10 = vcmp.ge.s32.totalorder %v328_v34, 0  ;;  %vm343_vm11 = vcmp.lt.s32.totalorder %v327_v33, 16  ;;  %vm344_vm12 = vcmp.lt.s32.totalorder %v328_v34, 16 }
   0xa   :  { %vm350_vm6 = vmand %vm334_vm2, %vm342_vm4  ;;  %v2301_v27 = vsel %vm349_vm5, 1.0, %v2175_v26  ;;  %vm337_vm15 = vcmp.ge.s32.totalorder %v329_v40, 0  ;;  %vm338_vm1 = vcmp.ge.s32.totalorder %v330_v41, 0  ;;  %vm345_vm2 = vcmp.lt.s32.totalorder %v329_v40, 16 }
   0xb   :  { %1858 = vmatmul.mubr.msk.f32.gmra.mrb[2].mxu0 %vm50_vm0, %v29_v11  ;;  %v2304_v28 = vsel %vm350_vm6, 1.0, %v2175_v26  ;;  %vm351_vm13 = vmand %vm335_vm9, %vm343_vm11  ;;  %vm346_vm3 = vcmp.lt.s32.totalorder %v330_v41, 16  ;;  %v331_v47 = vsub.s32 %v320_v45, %v324_v23  ;;  %v332_v48 = vsub.s32 %v321_v46, %v324_v23 }
   0xc   :  { %1875 = vmatmul.mubr.msk.f32.gmra.mrb[4].mxu1 %vm50_vm0, %v39_v12  ;;  %1860 = vmatprep.mubr.msk.f32.mxu0 %vm50_vm0, %v30_v13  ;;  %v2021_v29 = vpack.c.bf16 %v2304_v28, %v2301_v27  ;;  %vm352_vm14 = vmand %vm336_vm10, %vm344_vm12  ;;  %v2323_v35 = vsel %vm351_vm13, 1.0, %v2175_v26  ;;  %v2176_v24 = vmov 0.0|0.0  }
   0xd   :  { %1877 = vmatprep.mubr.msk.f32.mxu1 %vm50_vm0, %v40_v14  ;;  %v2326_v36 = vsel %vm352_vm14, 1.0, %v2175_v26  ;;  %vm353_vm4 = vmand %vm337_vm15, %vm345_vm2  ;;  %vm339_vm6 = vcmp.ge.s32.totalorder %v331_v47, 0  ;;  %vm340_vm9 = vcmp.ge.s32.totalorder %v332_v48, 0  ;;  %vm347_vm10 = vcmp.lt.s32.totalorder %v331_v47, 16 }
   0xe   :  { %2023 = vmatprep.subr.msk.bf16.mxu0 %vm2310_vm8, %v2021_v29  ;;  %v2027_v37 = vpack.c.bf16 %v2326_v36, %v2323_v35  ;;  %vm354_vm5 = vmand %vm338_vm1, %vm346_vm3  ;;  %v2337_v42 = vsel %vm353_vm4, 1.0, %v2175_v26  ;;  %vm348_vm11 = vcmp.lt.s32.totalorder %v332_v48, 16  ;;  %vm2177_vm14 = vmmov 0  }
   0xf   :  { %1861 = vmatmul.mubr.msk.f32.gmra.mrb[4].mxu0 %vm50_vm0, %v31_v15  ;;  %v2340_v43 = vsel %vm354_vm5, 1.0, %v2175_v26  ;;  %vm355_vm12 = vmand %vm339_vm6, %vm347_vm10  ;;  %vm1108_vm15 = vcmask 1043456  }
  0x10   :  { %1878 = vmatmul.mubr.msk.f32.gmra.mrb[6].mxu1 %vm50_vm0, %v41_v16  ;;  %1863 = vmatprep.mubr.msk.f32.mxu0 %vm50_vm0, %v32_v17  ;;  %v2033_v44 = vpack.c.bf16 %v2340_v43, %v2337_v42  ;;  %vm356_vm13 = vmand %vm340_vm9, %vm348_vm11  ;;  %v2351_v49 = vsel %vm355_vm12, 1.0, %v2175_v26 }
  0x11   :  { %2026 = vmatpush3.bf16.xpose.msk.msra.mxu0 %vm2310_vm8, %v2021_v29  ;;  %v2354_v50 = vsel %vm356_vm13, 1.0, %v2175_v26 }
  0x12   :  { %2029 = vmatprep.subr.msk.bf16.mxu0 %vm2310_vm8, %v2027_v37  ;;  %v2039_v51 = vpack.c.bf16 %v2354_v50, %v2351_v49 }
  0x13   :  { %1864 = vmatmul.mubr.msk.f32.gmra.mrb[6].mxu0 %vm50_vm0, %v33_v18 }
  0x14   :  { %1896 = vmatprep.mubr.msk.f32.mxu0 %vm373_vm7, %v2301_v27 }
  0x19   :  { %2032 = vmatpush3.bf16.xpose.msk.msra.mxu0 %vm2310_vm8, %v2027_v37 }
  0x1a   :  { %2035 = vmatprep.subr.msk.bf16.mxu0 %vm2310_vm8, %v2033_v44 }
  0x21   :  { %2038 = vmatpush3.bf16.xpose.msk.msra.mxu0 %vm2310_vm8, %v2033_v44 }
  0x22   :  { %2041 = vmatprep.subr.msk.bf16.mxu0 %vm2310_vm8, %v2039_v51 }
  0x29   :  { %2044 = vmatpush3.bf16.xpose.msk.msra.mxu0 %vm2310_vm8, %v2039_v51 }
  0x30   :  { %1897 = vmatmul.mubr.msk.f32.vlgmr.msra.gmra.mrb[8].mxu0 %vm373_vm7, %v2304_v28 }
  0x31   :  { %1899 = vmatprep.mubr.msk.f32.mxu0 %vm373_vm7, %v2323_v35 }
  0x34   :  { %1900 = vmatmul.mubr.msk.f32.gmra.mrb[10].mxu0 %vm373_vm7, %v2326_v36 }
  0x35   :  { %1902 = vmatprep.mubr.msk.f32.mxu0 %vm373_vm7, %v2337_v42 }
  0x38   :  { %1903 = vmatmul.mubr.msk.f32.gmra.mrb[12].mxu0 %vm373_vm7, %v2340_v43 }
  0x39   :  { %1905 = vmatprep.mubr.msk.f32.mxu0 %vm373_vm7, %v2351_v49 }
  0x3c   :  { %1906 = vmatmul.mubr.msk.f32.gmra.mrb[14].mxu0 %vm373_vm7, %v2354_v50 }
  0x79   :  { %v182_v52 = vpop.permute.xlu0 %181 }
  0xd7   :  { %v1870_v53 = vpop.f32.mrb[0].mxu1 }
  0xd8   :  { %v280_v54 = vadd.f32 %v1870_v53, %v182_v52  ;;  %v274_v55 = vpop.f32.mrb[1].mxu1 }
  0xd9   :  { %v275_v56 = vadd.f32 %v274_v55, %v182_v52 }
  0xda   :  { %v1856_v57 = vpop.f32.mrb[0].mxu0 }
  0xdb   :  { %v2110_v58 = vpack.i.bf16 %v280_v54, %v275_v56  ;;  %v2045_v59 = vpack.c.bf16 %v280_v54, %v275_v56  ;;  %v1873_v60 = vpop.f32.mrb[2].mxu1  ;;  %v141_v61 = vpop.f32.mrb[1].mxu0  ;;  %v147_v29 = vadd.f32 %v1856_v57, %v2257_v10 }
  0xdc   :  { %v290_v62 = vadd.f32 %v1873_v60, %v182_v52  ;;  %v284_v63 = vpop.f32.mrb[3].mxu1  ;;  %v142_v0 = vadd.f32 %v2257_v10, %v141_v61 }
  0xdd   :  { %v285_v1 = vadd.f32 %v284_v63, %v182_v52  ;;  %2111 = vrot.lane.b32.xlu0 %v2110_v58, %s2174_s4  ;;  %2047 = vmatprep.subr.msk.bf16.mxu1 %vm2310_vm8, %v2045_v59 }
  0xde   :  { %2050 = vmatpush3.bf16.xpose.msk.msra.mxu1 %vm2310_vm8, %v2045_v59  ;;  %1924 = vmatprep.mubr.msk.f32.mxu1 %vm373_vm7, %v142_v0  ;;  %v1859_v2 = vpop.f32.mrb[2].mxu0 }
  0xdf   :  { %v2051_v3 = vpack.c.bf16 %v290_v62, %v285_v1  ;;  %v1876_v4 = vpop.f32.mrb[4].mxu1  ;;  %v2115_v5 = vpack.i.bf16 %v290_v62, %v285_v1  ;;  %v151_v6 = vpop.f32.mrb[3].mxu0  ;;  %v157_v31 = vadd.f32 %v1859_v2, %v2257_v10 }
  0xe0   :  { %v300_v7 = vadd.f32 %v1876_v4, %v182_v52  ;;  %v294_v8 = vpop.f32.mrb[5].mxu1  ;;  %v152_v25 = vadd.f32 %v2257_v10, %v151_v6 }
  0xe1   :  { %v295_v9 = vadd.f32 %v294_v8, %v182_v52  ;;  %2116 = vrot.lane.b32.xlu1 %v2115_v5, %s2174_s4  ;;  %2053 = vmatprep.subr.msk.bf16.mxu1 %vm2310_vm8, %v2051_v3 }
  0xe2   :  { %v1862_v11 = vpop.f32.mrb[4].mxu0 }
  0xe3   :  { %v2120_v12 = vpack.i.bf16 %v300_v7, %v295_v9  ;;  %v2057_v13 = vpack.c.bf16 %v300_v7, %v295_v9  ;;  %v1879_v14 = vpop.f32.mrb[6].mxu1  ;;  %v161_v15 = vpop.f32.mrb[5].mxu0  ;;  %v167_v33 = vadd.f32 %v1862_v11, %v2257_v10 }
  0xe4   :  { %v310_v16 = vadd.f32 %v1879_v14, %v182_v52  ;;  %v304_v17 = vpop.f32.mrb[7].mxu1  ;;  %v162_v32 = vadd.f32 %v2257_v10, %v161_v15 }
  0xe5   :  { %v305_v18 = vadd.f32 %v304_v17, %v182_v52  ;;  %2121 = vrot.lane.b32.xlu1 %v2120_v12, %s2174_s4 }
  0xe6   :  { %2056 = vmatpush3.bf16.xpose.msk.msra.mxu1 %vm2310_vm8, %v2051_v3  ;;  %v1865_v19 = vpop.f32.mrb[6].mxu0 }
  0xe7   :  { %v2125_v21 = vpack.i.bf16 %v310_v16, %v305_v18  ;;  %v2063_v22 = vpack.c.bf16 %v310_v16, %v305_v18  ;;  %2059 = vmatprep.subr.msk.bf16.mxu1 %vm2310_vm8, %v2057_v13  ;;  %v171_v23 = vpop.f32.mrb[7].mxu0  ;;  %v177_v34 = vadd.f32 %v1865_v19, %v2257_v10 }
  0xe8   :  { %v172_v30 = vadd.f32 %v2257_v10, %v171_v23 }
  0xe9   :  { %2126 = vrot.lane.b32.xlu0 %v2125_v21, %s2174_s4 }
  0xee   :  { %2062 = vmatpush3.bf16.xpose.msk.msra.mxu1 %vm2310_vm8, %v2057_v13 }
  0xef   :  { %2065 = vmatprep.subr.msk.bf16.mxu1 %vm2310_vm8, %v2063_v22 }
  0xf6   :  { %2068 = vmatpush3.bf16.xpose.msk.msra.mxu1 %vm2310_vm8, %v2063_v22  ;;  %vm672_vm8 = vcmask 523264  }
  0xf7   :  { %2085 = vmatprep.subr.bf16.mxu1 %v2176_v24 }
  0xfd   :  { %1925 = vmatmul.mubr.msk.f32.vlgmr.msra.gmra.mrb[8].mxu1 %vm373_vm7, %v147_v29 }
  0xfe   :  { %1927 = vmatprep.mubr.msk.f32.mxu1 %vm373_vm7, %v152_v25 }
 0x101   :  { %1928 = vmatmul.mubr.msk.f32.gmra.mrb[10].mxu1 %vm373_vm7, %v157_v31 }
 0x102   :  { %1930 = vmatprep.mubr.msk.f32.mxu1 %vm373_vm7, %v162_v32 }
 0x103   :  { %v1898_v37 = vpop.f32.mrb[8].mxu0 }
 0x104   :  { %v464_v38 = vpop.f32.mrb[9].mxu0  ;;  %v1701_v0 = vadd.f32 -1.0, %v1898_v37 }
 0x105   :  { %1931 = vmatmul.mubr.msk.f32.gmra.mrb[12].mxu1 %vm373_vm7, %v167_v33  ;;  %v1700_v1 = vadd.f32 -1.0, %v464_v38 }
 0x106   :  { %1933 = vmatprep.mubr.msk.f32.mxu1 %vm373_vm7, %v172_v30  ;;  %v512_v2 = vmul.f32 1e+30, %v1701_v0 }
 0x107   :  { %v1901_v44 = vpop.f32.mrb[10].mxu0  ;;  %v511_v4 = vmul.f32 1e+30, %v1700_v1 }
 0x108   :  { %v474_v45 = vpop.f32.mrb[11].mxu0  ;;  %v1703_v3 = vadd.f32 -1.0, %v1901_v44 }
 0x109   :  { %1934 = vmatmul.mubr.msk.f32.gmra.mrb[14].mxu1 %vm373_vm7, %v177_v34  ;;  %v1702_v5 = vadd.f32 -1.0, %v474_v45 }
 0x10a   :  { %v514_v7 = vmul.f32 1e+30, %v1703_v3  ;;  %1980 = vmatprep.mubr.msk.f32.mxu1 %vm2177_vm14, %v2175_v26 }
 0x10b   :  { %v1904_v52 = vpop.f32.mrb[12].mxu0  ;;  %v513_v12 = vmul.f32 1e+30, %v1702_v5 }
 0x10c   :  { %v484_v10 = vpop.f32.mrb[13].mxu0  ;;  %v1705_v11 = vadd.f32 -1.0, %v1904_v52 }
 0x10d   :  { %v1704_v14 = vadd.f32 -1.0, %v484_v10 }
 0x10e   :  { %v516_v18 = vmul.f32 1e+30, %v1705_v11 }
 0x10f   :  { %v1907_v57 = vpop.f32.mrb[14].mxu0  ;;  %v515_v23 = vmul.f32 1e+30, %v1704_v14 }
 0x110   :  { %v494_v58 = vpop.f32.mrb[15].mxu0  ;;  %v1707_v22 = vadd.f32 -1.0, %v1907_v57 }
 0x111   :  { %v1706_v25 = vadd.f32 -1.0, %v494_v58 }
 0x112   :  { %v518_v33 = vmul.f32 1e+30, %v1707_v22 }
 0x113   :  { %v517_v37 = vmul.f32 1e+30, %v1706_v25 }
 0x14f   :  { %v2112_v39 = vpop.permute.xlu0 %2111 }
 0x150   :  { %v2114_v40 = vunpack.i.h.bf16 %v2112_v39  ;;  %v2113_v41 = vunpack.i.l.bf16 %v2112_v39 }
 0x152   :  { %v2086_v46 = vpack.c.bf16 %v2114_v40, %v2113_v41 }
 0x153   :  { %v2117_v47 = vpop.permute.xlu1 %2116 }
 0x154   :  { %v2119_v48 = vunpack.i.h.bf16 %v2117_v47  ;;  %v2118_v51 = vunpack.i.l.bf16 %v2117_v47  ;;  %2087 = vmatpush3.bf16.msra.mxu1 %v2086_v46 }
 0x155   :  { %2088 = vmatprep.subr.bf16.mxu1 %v2176_v24 }
 0x156   :  { %v2089_v53 = vpack.c.bf16 %v2119_v48, %v2118_v51 }
 0x157   :  { %v2122_v54 = vpop.permute.xlu1 %2121 }
 0x158   :  { %v2124_v55 = vunpack.i.h.bf16 %v2122_v54  ;;  %v2123_v56 = vunpack.i.l.bf16 %v2122_v54  ;;  %2090 = vmatpush3.bf16.msra.mxu1 %v2089_v53 }
 0x159   :  { %2091 = vmatprep.subr.bf16.mxu1 %v2176_v24 }
 0x15a   :  { %v2092_v59 = vpack.c.bf16 %v2124_v55, %v2123_v56 }
 0x15b   :  { %v2127_v60 = vpop.permute.xlu0 %2126 }
 0x15c   :  { %v2129_v61 = vunpack.i.h.bf16 %v2127_v60  ;;  %v2128_v62 = vunpack.i.l.bf16 %v2127_v60  ;;  %2093 = vmatpush3.bf16.msra.mxu1 %v2092_v59 }
 0x15d   :  { %2094 = vmatprep.subr.bf16.mxu1 %v2176_v24 }
 0x15e   :  { %v2095_v63 = vpack.c.bf16 %v2129_v61, %v2128_v62 }
 0x160   :  { %2096 = vmatpush3.bf16.msra.mxu1 %v2095_v63 }
 0x161   :  { %1983 = vmatprep.subr.mxu1 %v2175_v26 }
 0x1d0   :  { %v1926_v6 = vpop.f32.mrb[8].mxu1 }
 0x1d1   :  { %v639_v8 = vadd.f32 %v1926_v6, %v512_v2  ;;  %v633_v9 = vpop.f32.mrb[9].mxu1 }
 0x1d2   :  { %v634_v13 = vadd.f32 %v633_v9, %v511_v4 }
 0x1d3   :  { %v676_v15 = vsel %vm672_vm8, %v639_v8, -inf }
 0x1d4   :  { %677 = vmax.xlane.f32.xlu0 %v676_v15  ;;  %v1929_v16 = vpop.f32.mrb[10].mxu1  ;;  %v673_v17 = vsel %vm672_vm8, %v634_v13, -inf }
 0x1d5   :  { %v649_v19 = vadd.f32 %v1929_v16, %v514_v7  ;;  %v643_v21 = vpop.f32.mrb[11].mxu1  ;;  %674 = vmax.xlane.f32.xlu1 %v673_v17 }
 0x1d6   :  { %v644_v24 = vadd.f32 %v643_v21, %v513_v12 }
 0x1d7   :  { %v682_v29 = vsel %vm672_vm8, %v649_v19, -inf }
 0x1d8   :  { %v1932_v31 = vpop.f32.mrb[12].mxu1  ;;  %v679_v32 = vsel %vm672_vm8, %v644_v24, -inf }
 0x1d9   :  { %v659_v30 = vadd.f32 %v1932_v31, %v516_v18  ;;  %v653_v34 = vpop.f32.mrb[13].mxu1  ;;  %680 = vmax.xlane.f32.xlu0 %v679_v32  ;;  %683 = vmax.xlane.f32.xlu1 %v682_v29 }
 0x1da   :  { %v654_v38 = vadd.f32 %v653_v34, %v515_v23 }
 0x1db   :  { %v688_v39 = vsel %vm672_vm8, %v659_v30, -inf }
 0x1dc   :  { %v1935_v40 = vpop.f32.mrb[14].mxu1  ;;  %v685_v41 = vsel %vm672_vm8, %v654_v38, -inf }
 0x1dd   :  { %v669_v44 = vadd.f32 %v1935_v40, %v518_v33  ;;  %v663_v45 = vpop.f32.mrb[15].mxu1  ;;  %686 = vmax.xlane.f32.xlu0 %v685_v41  ;;  %689 = vmax.xlane.f32.xlu1 %v688_v39  ;;  %v2445_v33 = vld [vmem:[%s2618_s5] sm:$0xff] }
 0x1de   :  { %v664_v46 = vadd.f32 %v663_v45, %v517_v37 }
 0x1df   :  { %v694_v47 = vsel %vm672_vm8, %v669_v44, -inf }
 0x1e0   :  { %v691_v48 = vsel %vm672_vm8, %v664_v46, -inf }
 0x1e1   :  { %692 = vmax.xlane.f32.xlu0 %v691_v48  ;;  %695 = vmax.xlane.f32.xlu1 %v694_v47 }
 0x20e   :  { %970 = vxpose.xlu0.b32.start [1/8] (short) (narrow) %v2301_v27, 8 }
 0x212   :  { %971 = vxpose.xlu0.b32.cont [2/8] (short) (narrow) %v2304_v28, 8 }
 0x216   :  { %972 = vxpose.xlu0.b32.cont [3/8] (short) (narrow) %v2323_v35, 8 }
 0x21a   :  { %973 = vxpose.xlu0.b32.cont [4/8] (short) (narrow) %v2326_v36, 8 }
 0x21e   :  { %974 = vxpose.xlu0.b32.cont [5/8] (short) (narrow) %v2337_v42, 8 }
 0x222   :  { %975 = vxpose.xlu0.b32.cont [6/8] (short) (narrow) %v2340_v43, 8 }
 0x226   :  { %976 = vxpose.xlu0.b32.cont [7/8] (short) (narrow) %v2351_v49, 8 }
 0x22a   :  { %977 = vxpose.xlu0.b32.end [8/8] (short) (narrow) %v2354_v50, 8 }
 0x261   :  { %v678_v51 = vpop.xlane.xlu0 %677 }
 0x262   :  { %v698_v52 = vsub.f32 %v639_v8, %v678_v51  ;;  %v675_v10 = vpop.xlane.xlu1 %674 }
 0x263   :  { %v697_v53 = vsub.f32 %v634_v13, %v675_v10 }
 0x264   :  { %v707_v54 = vmul.f32 1.442695, %v698_v52 }
 0x265   :  { %v705_v55 = vmul.f32 1.442695, %v697_v53 }
 0x266   :  { %2132 = vpow2.f32 %v707_v54  ;;  %v681_v56 = vpop.xlane.xlu0 %680  ;;  %v684_v57 = vpop.xlane.xlu1 %683 }
 0x267   :  { %v700_v58 = vsub.f32 %v649_v19, %v684_v57  ;;  %2134 = vpow2.f32 %v705_v55  ;;  %v699_v59 = vsub.f32 %v644_v24, %v681_v56 }
 0x269   :  { %v711_v60 = vmul.f32 1.442695, %v700_v58  ;;  %v709_v62 = vmul.f32 1.442695, %v699_v59 }
 0x26a   :  { %v690_v61 = vpop.xlane.xlu1 %689  ;;  %v687_v0 = vpop.xlane.xlu0 %686 }
 0x26b   :  { %2136 = vpow2.f32 %v711_v60  ;;  %v702_v63 = vsub.f32 %v659_v30, %v690_v61  ;;  %v701_v2 = vsub.f32 %v654_v38, %v687_v0  ;;  %v2178_v30 = vmov 0  }
 0x26c   :  { %2138 = vpow2.f32 %v709_v62  ;;  %2130 = vset.pattern.permute.xlu0 %v2178_v30 }
 0x26d   :  { %v715_v3 = vmul.f32 1.442695, %v702_v63  ;;  %v713_v7 = vmul.f32 1.442695, %v701_v2 }
 0x26e   :  { %v696_v4 = vpop.xlane.xlu1 %695  ;;  %v693_v9 = vpop.xlane.xlu0 %692 }
 0x26f   :  { %2140 = vpow2.f32 %v715_v3  ;;  %v704_v8 = vsub.f32 %v669_v44, %v696_v4  ;;  %v703_v13 = vsub.f32 %v664_v46, %v693_v9 }
 0x270   :  { %v2133_v1 = vpop.eup %2132  ;;  %2142 = vpow2.f32 %v713_v7 }
 0x271   :  { %v724_v5 = vsel %vm672_vm8, %v2133_v1, 0.0  ;;  %v2135_v6 = vpop.eup %2134  ;;  %v719_v14 = vmul.f32 1.442695, %v704_v8  ;;  %v717_v17 = vmul.f32 1.442695, %v703_v13 }
 0x272   :  { %725 = vadd.xlane.f32.xlu1 %v724_v5  ;;  %v721_v11 = vsel %vm672_vm8, %v2135_v6, 0.0 }
 0x273   :  { %2144 = vpow2.f32 %v719_v14 }
 0x274   :  { %2146 = vpow2.f32 %v717_v17 }
 0x275   :  { %v2137_v12 = vpop.eup %2136 }
 0x276   :  { %722 = vadd.xlane.f32.xlu1 %v721_v11  ;;  %v730_v15 = vsel %vm672_vm8, %v2137_v12, 0.0  ;;  %v2139_v16 = vpop.eup %2138 }
 0x277   :  { %v727_v18 = vsel %vm672_vm8, %v2139_v16, 0.0 }
 0x279   :  { %v2141_v19 = vpop.eup %2140 }
 0x27a   :  { %731 = vadd.xlane.f32.xlu1 %v730_v15  ;;  %v736_v21 = vsel %vm672_vm8, %v2141_v19, 0.0  ;;  %v2143_v22 = vpop.eup %2142 }
 0x27b   :  { %v733_v23 = vsel %vm672_vm8, %v2143_v22, 0.0 }
 0x27d   :  { %v2145_v24 = vpop.eup %2144 }
 0x27e   :  { %728 = vadd.xlane.f32.xlu1 %v727_v18  ;;  %v742_v25 = vsel %vm672_vm8, %v2145_v24, 0.0  ;;  %v2147_v29 = vpop.eup %2146 }
 0x27f   :  { %v739_v31 = vsel %vm672_vm8, %v2147_v29, 0.0 }
 0x282   :  { %737 = vadd.xlane.f32.xlu1 %v736_v21 }
 0x286   :  { %734 = vadd.xlane.f32.xlu1 %v733_v23 }
 0x28a   :  { %743 = vadd.xlane.f32.xlu1 %v742_v25 }
 0x28e   :  { %740 = vadd.xlane.f32.xlu1 %v739_v31  ;;  %v986_v32 = vpop.trf.xlu0 }
 0x28f   :  { %1981 = vmatmul.mubr.msk.f32.vlgmr.msra.gmra.mrb[16].mxu1 %vm672_vm8, %v986_v32 }
 0x290   :  { %1985 = vmatprep.mubr.msk.f32.mxu1 %vm2177_vm14, %v2175_v26  ;;  %1984 = vmatpush3.msk.msra.mxu1 %vm1108_vm15, %v2445_v33 }
 0x291   :  { %1988 = vmatprep.subr.mxu1 %v2175_v26 }
 0x2c1   :  { %809 = vxpose.xlu1.b32.start [1/8] (short) (narrow) %v2135_v6, 64 }
 0x2c5   :  { %810 = vxpose.xlu1.b32.cont [2/8] (short) (narrow) %v2133_v1, 64 }
 0x2c9   :  { %811 = vxpose.xlu1.b32.cont [3/8] (short) (narrow) %v2139_v16, 64 }
 0x2cd   :  { %812 = vxpose.xlu1.b32.cont [4/8] (short) (narrow) %v2137_v12, 64 }
 0x2d1   :  { %813 = vxpose.xlu1.b32.cont [5/8] (short) (narrow) %v2143_v22, 64 }
 0x2d5   :  { %814 = vxpose.xlu1.b32.cont [6/8] (short) (narrow) %v2141_v19, 64 }
 0x2d9   :  { %815 = vxpose.xlu1.b32.cont [7/8] (short) (narrow) %v2147_v29, 64 }
 0x2dd   :  { %816 = vxpose.xlu1.b32.end [8/8] (short) (narrow) %v2145_v24, 64 }
 0x2fb   :  { %2131 = vset.pattern.permute.xlu1 %v2178_v30 }
 0x2ff   :  { %v726_v34 = vpop.xlane.xlu1 %725 }
 0x300   :  { %2148 = vrcp.f32 %v726_v34 }
 0x303   :  { %v723_v37 = vpop.xlane.xlu1 %722 }
 0x304   :  { %2150 = vrcp.f32 %v723_v37 }
 0x307   :  { %v732_v38 = vpop.xlane.xlu1 %731 }
 0x308   :  { %2152 = vrcp.f32 %v732_v38 }
 0x30a   :  { %v2149_v39 = vpop.eup %2148 }
 0x30b   :  { %v754_v40 = vmul.f32 %v2149_v39, %v726_v34  ;;  %v729_v41 = vpop.xlane.xlu1 %728 }
 0x30c   :  { %2154 = vrcp.f32 %v729_v41 }
 0x30d   :  { %v762_v44 = vsub.f32 2.0, %v754_v40 }
 0x30e   :  { %v2151_v45 = vpop.eup %2150 }
 0x30f   :  { %v770_v46 = vmul.f32 %v2149_v39, %v762_v44  ;;  %v753_v47 = vmul.f32 %v2151_v45, %v723_v37  ;;  %v738_v48 = vpop.xlane.xlu1 %737 }
 0x310   :  { %2156 = vrcp.f32 %v738_v48 }
 0x311   :  { %v778_v51 = vmul.f32 %v770_v46, %v726_v34  ;;  %v761_v52 = vsub.f32 2.0, %v753_v47 }
 0x312   :  { %v2153_v10 = vpop.eup %2152 }
 0x313   :  { %v786_v53 = vsub.f32 2.0, %v778_v51  ;;  %v769_v54 = vmul.f32 %v2151_v45, %v761_v52  ;;  %v756_v55 = vmul.f32 %v2153_v10, %v732_v38  ;;  %v735_v56 = vpop.xlane.xlu1 %734 }
 0x314   :  { %2158 = vrcp.f32 %v735_v56 }
 0x315   :  { %v777_v57 = vmul.f32 %v769_v54, %v723_v37  ;;  %v764_v58 = vsub.f32 2.0, %v756_v55  ;;  %v794_v60 = vmul.f32 %v786_v53, %v770_v46 }
 0x316   :  { %v2155_v59 = vpop.eup %2154 }
 0x317   :  { %v785_v61 = vsub.f32 2.0, %v777_v57  ;;  %v772_v62 = vmul.f32 %v2153_v10, %v764_v58  ;;  %v755_v63 = vmul.f32 %v2155_v59, %v729_v41  ;;  %v744_v0 = vpop.xlane.xlu1 %743  ;;  %v802_v5 = vmul.f32 0.0625, %v794_v60 }
 0x318   :  { %2160 = vrcp.f32 %v744_v0 }
 0x319   :  { %v793_v1 = vmul.f32 %v785_v61, %v769_v54  ;;  %v780_v2 = vmul.f32 %v772_v62, %v732_v38  ;;  %v763_v3 = vsub.f32 2.0, %v755_v63 }
 0x31a   :  { %v2157_v4 = vpop.eup %2156 }
 0x31b   :  { %v788_v6 = vsub.f32 2.0, %v780_v2  ;;  %v771_v7 = vmul.f32 %v2155_v59, %v763_v3  ;;  %v758_v8 = vmul.f32 %v2157_v4, %v738_v48  ;;  %v741_v9 = vpop.xlane.xlu1 %740  ;;  %v801_v11 = vmul.f32 0.0625, %v793_v1 }
 0x31c   :  { %2162 = vrcp.f32 %v741_v9 }
 0x31d   :  { %v779_v12 = vmul.f32 %v771_v7, %v729_v41  ;;  %v766_v13 = vsub.f32 2.0, %v758_v8  ;;  %v2069_v14 = vpack.c.bf16 %v802_v5, %v801_v11  ;;  %v796_v16 = vmul.f32 %v788_v6, %v772_v62 }
 0x31e   :  { %v2159_v15 = vpop.eup %2158  ;;  %v1182_v6 = vrot.slane %v2445_v33, 4 }
 0x31f   :  { %v787_v17 = vsub.f32 2.0, %v779_v12  ;;  %v774_v18 = vmul.f32 %v2157_v4, %v766_v13  ;;  %v757_v19 = vmul.f32 %v2159_v15, %v735_v56  ;;  %2070 = vmatprep.subr.bf16.mxu0 %v2069_v14  ;;  %v804_v25 = vmul.f32 0.0625, %v796_v16 }
 0x320   :  { %2072 = vmatpush3.bf16.msra.mxu0 %v2069_v14 }
 0x321   :  { %v795_v21 = vmul.f32 %v787_v17, %v771_v7  ;;  %v782_v22 = vmul.f32 %v774_v18, %v738_v48  ;;  %v765_v23 = vsub.f32 2.0, %v757_v19 }
 0x322   :  { %v2161_v24 = vpop.eup %2160 }
 0x323   :  { %v790_v29 = vsub.f32 2.0, %v782_v22  ;;  %v773_v31 = vmul.f32 %v2159_v15, %v765_v23  ;;  %v760_v32 = vmul.f32 %v2161_v24, %v744_v0  ;;  %v803_v30 = vmul.f32 0.0625, %v795_v21 }
 0x324   :  { %v1103_v15 = vsub.s32 0, %v2296_v20 }
 0x325   :  { %v781_v34 = vmul.f32 %v773_v31, %v735_v56  ;;  %v768_v37 = vsub.f32 2.0, %v760_v32  ;;  %v2073_v38 = vpack.c.bf16 %v804_v25, %v803_v30  ;;  %v798_v40 = vmul.f32 %v790_v29, %v774_v18 }
 0x326   :  { %v2163_v39 = vpop.eup %2162 }
 0x327   :  { %v789_v41 = vsub.f32 2.0, %v781_v34  ;;  %v776_v44 = vmul.f32 %v2161_v24, %v768_v37  ;;  %v759_v45 = vmul.f32 %v2163_v39, %v741_v9  ;;  %2074 = vmatprep.subr.bf16.mxu0 %v2073_v38  ;;  %v806_v53 = vmul.f32 0.0625, %v798_v40 }
 0x328   :  { %2076 = vmatpush3.bf16.msra.mxu0 %v2073_v38 }
 0x329   :  { %v797_v46 = vmul.f32 %v789_v41, %v773_v31  ;;  %v784_v47 = vmul.f32 %v776_v44, %v744_v0  ;;  %v767_v48 = vsub.f32 2.0, %v759_v45 }
 0x32b   :  { %v792_v51 = vsub.f32 2.0, %v784_v47  ;;  %v775_v52 = vmul.f32 %v2163_v39, %v767_v48  ;;  %v805_v10 = vmul.f32 0.0625, %v797_v46 }
 0x32d   :  { %v783_v54 = vmul.f32 %v775_v52, %v741_v9  ;;  %v2077_v55 = vpack.c.bf16 %v806_v53, %v805_v10  ;;  %v800_v57 = vmul.f32 %v792_v51, %v776_v44 }
 0x32f   :  { %v791_v56 = vsub.f32 2.0, %v783_v54  ;;  %2078 = vmatprep.subr.bf16.mxu0 %v2077_v55  ;;  %v808_v60 = vmul.f32 0.0625, %v800_v57 }
 0x330   :  { %2080 = vmatpush3.bf16.msra.mxu0 %v2077_v55 }
 0x331   :  { %v799_v58 = vmul.f32 %v791_v56, %v775_v52 }
 0x333   :  { %v807_v59 = vmul.f32 0.0625, %v799_v58 }
 0x335   :  { %v2081_v61 = vpack.c.bf16 %v808_v60, %v807_v59 }
 0x337   :  { %2082 = vmatprep.subr.bf16.mxu0 %v2081_v61 }
 0x338   :  { %2084 = vmatpush3.bf16.msra.mxu0 %v2081_v61 }
 0x341   :  { %v825_v62 = vpop.trf.xlu1 }
 0x342   :  { %1952 = vmatprep.mubr.msk.f32.mxu0 %vm672_vm8, %v825_v62 }
 0x345   :  { %v826_v63 = vpop.trf.xlu1 }
 0x346   :  { %1953 = vmatmul.mubr.msk.f32.vlgmr.msra.gmra.mrb[16].mxu0 %vm672_vm8, %v826_v63 }
 0x349   :  { %v827_v0 = vpop.trf.xlu1 }
 0x34a   :  { %1955 = vmatprep.mubr.msk.f32.mxu0 %vm672_vm8, %v827_v0 }
 0x34d   :  { %v828_v1 = vpop.trf.xlu1 }
 0x34e   :  { %1956 = vmatmul.mubr.msk.f32.gmra.mrb[18].mxu0 %vm672_vm8, %v828_v1 }
 0x351   :  { %v829_v2 = vpop.trf.xlu1 }
 0x352   :  { %1958 = vmatprep.mubr.msk.f32.mxu0 %vm672_vm8, %v829_v2 }
 0x355   :  { %v830_v3 = vpop.trf.xlu1 }
 0x356   :  { %1959 = vmatmul.mubr.msk.f32.gmra.mrb[20].mxu0 %vm672_vm8, %v830_v3 }
 0x359   :  { %v831_v4 = vpop.trf.xlu1 }
 0x35a   :  { %1961 = vmatprep.mubr.msk.f32.mxu0 %vm672_vm8, %v831_v4 }
 0x35d   :  { %v832_v5 = vpop.trf.xlu1 }
 0x35e   :  { %1962 = vmatmul.mubr.msk.f32.gmra.mrb[22].mxu0 %vm672_vm8, %v832_v5 }
 0x362   :  { %v1095_v7 = vpop.f32.mrb[16].mxu1 }
 0x363   :  { %1986 = vmatmul.mubr.msk.f32.vlgmr.msra.gmra.mrb[18].mxu1 %vm373_vm7, %v1095_v7  ;;  %v1982_v8 = vpop.f32.mrb[17].mxu1 }
 0x364   :  { %1989 = vmatpush3.msk.msra.mxu1 %vm1108_vm15, %v1182_v6  ;;  %1990 = vmatprep.mubr.msk.f32.mxu1 %vm2177_vm14, %v2175_v26  ;;  %v2470_v26 = vld [vmem:[%s2619_s6] sm:$0x7] }
 0x365   :  { %v1104_v18 = vrot.slane %v2470_v26, %v1103_v15 }
 0x367   :  { %1991 = vmatmul.mubr.msk.f32.vlgmr.msra.gmra.mrb[20].mxu1 %vm373_vm7, %v1095_v7 }
 0x368   :  { %2009 = vmatprep.mubr.msk.f32.mxu1 %vm373_vm7, %v2301_v27 }
 0x419   :  { %v1954_v9 = vpop.f32.mrb[16].mxu0 }
 0x41a   :  { %1262 = vperm.xlu1 %2131, %v1954_v9   ;;  %v931_v11 = vpop.f32.mrb[17].mxu0 }
 0x41b   :  { %1257 = vperm.xlu0 %2130, %v931_v11  }
 0x421   :  { %v1957_v12 = vpop.f32.mrb[18].mxu0 }
 0x422   :  { %1272 = vperm.xlu0 %2130, %v1957_v12   ;;  %v941_v33 = vpop.f32.mrb[19].mxu0 }
 0x426   :  { %1267 = vperm.xlu0 %2130, %v941_v33  }
 0x429   :  { %v1960_v13 = vpop.f32.mrb[20].mxu0 }
 0x42a   :  { %1282 = vperm.xlu0 %2130, %v1960_v13   ;;  %v951_v14 = vpop.f32.mrb[21].mxu0 }
 0x42e   :  { %1277 = vperm.xlu0 %2130, %v951_v14  }
 0x431   :  { %v1963_v16 = vpop.f32.mrb[22].mxu0 }
 0x432   :  { %v961_v17 = vpop.f32.mrb[23].mxu0 }
 0x433   :  { %1287 = vperm.xlu0 %2130, %v961_v17  }
 0x436   :  { %v1178_v19 = vpop.f32.mrb[18].mxu1 }
 0x437   :  { %1292 = vperm.xlu0 %2130, %v1963_v16   ;;  %v1179_v21 = vadd.f32 %v1178_v19, %v1104_v18  ;;  %v1987_v22 = vpop.f32.mrb[19].mxu1 }
 0x439   :  { %2007 = vmatprep.subr.msk.mxu1 %vm1108_vm15, %v1179_v21 }
 0x43a   :  { %v1251_v23 = vpop.f32.mrb[20].mxu1  ;;  %2008 = vmatpush3.msk.msra.mxu1 %vm1108_vm15, %v1179_v21 }
 0x43b   :  { %v1992_v24 = vpop.f32.mrb[21].mxu1  ;;  %1993 = vmatprep.subr.msk.mxu0 %vm1108_vm15, %v1251_v23  ;;  %2010 = vmatmul.mubr.msk.f32.vlgmr.msra.gmra.mrb[22].mxu1 %vm373_vm7, %v2304_v28 }
 0x43c   :  { %1994 = vmatpush3.msk.msra.mxu0 %vm1108_vm15, %v1251_v23  ;;  %2012 = vmatprep.mubr.msk.f32.mxu1 %vm373_vm7, %v2323_v35 }
 0x43f   :  { %2013 = vmatmul.mubr.msk.f32.gmra.mrb[24].mxu1 %vm373_vm7, %v2326_v36 }
 0x440   :  { %2015 = vmatprep.mubr.msk.f32.mxu1 %vm373_vm7, %v2337_v42 }
 0x443   :  { %2016 = vmatmul.mubr.msk.f32.gmra.mrb[26].mxu1 %vm373_vm7, %v2340_v43 }
 0x444   :  { %2018 = vmatprep.mubr.msk.f32.mxu1 %vm373_vm7, %v2351_v49 }
 0x447   :  { %2019 = vmatmul.mubr.msk.f32.gmra.mrb[28].mxu1 %vm373_vm7, %v2354_v50 }
 0x499   :  { %v1263_v25 = vpop.permute.xlu1 %1262 }
 0x49a   :  { %v1258_v29 = vpop.permute.xlu0 %1257  ;;  %v1296_v32 = vmul.f32 %v2304_v28, %v1263_v25 }
 0x49b   :  { %v1295_v31 = vmul.f32 %v2301_v27, %v1258_v29 }
 0x49d   :  { %1995 = vmatprep.mubr.msk.f32.mxu0 %vm373_vm7, %v1295_v31 }
 0x49e   :  { %1996 = vmatmul.mubr.msk.f32.vlgmr.msra.gmra.mrb[24].mxu0 %vm373_vm7, %v1296_v32 }
 0x4a1   :  { %v1273_v30 = vpop.permute.xlu0 %1272 }
 0x4a2   :  { %v1298_v38 = vmul.f32 %v2326_v36, %v1273_v30 }
 0x4a5   :  { %v1268_v34 = vpop.permute.xlu0 %1267 }
 0x4a6   :  { %v1297_v37 = vmul.f32 %v2323_v35, %v1268_v34 }
 0x4a8   :  { %1998 = vmatprep.mubr.msk.f32.mxu0 %vm373_vm7, %v1297_v37 }
 0x4a9   :  { %v1283_v39 = vpop.permute.xlu0 %1282  ;;  %1999 = vmatmul.mubr.msk.f32.gmra.mrb[26].mxu0 %vm373_vm7, %v1298_v38 }
 0x4aa   :  { %v1300_v28 = vmul.f32 %v2340_v43, %v1283_v39 }
 0x4ad   :  { %v1278_v40 = vpop.permute.xlu0 %1277 }
 0x4ae   :  { %v1299_v27 = vmul.f32 %v2337_v42, %v1278_v40 }
 0x4b0   :  { %2001 = vmatprep.mubr.msk.f32.mxu0 %vm373_vm7, %v1299_v27 }
 0x4b1   :  { %2002 = vmatmul.mubr.msk.f32.gmra.mrb[28].mxu0 %vm373_vm7, %v1300_v28 }
 0x4b2   :  { %v1288_v41 = vpop.permute.xlu0 %1287 }
 0x4b3   :  { %v1301_v44 = vmul.f32 %v2351_v49, %v1288_v41 }
 0x4b5   :  { %2004 = vmatprep.mubr.msk.f32.mxu0 %vm373_vm7, %v1301_v44 }
 0x4b6   :  { %v1293_v35 = vpop.permute.xlu0 %1292 }
 0x4b7   :  { %v1302_v36 = vmul.f32 %v2354_v50, %v1293_v35 }
 0x4b9   :  { %2005 = vmatmul.mubr.msk.f32.gmra.mrb[30].mxu0 %vm373_vm7, %v1302_v36 }
 0x50e   :  { %v2011_v45 = vpop.f32.mrb[22].mxu1 }
 0x50f   :  { %v1504_v46 = vpop.f32.mrb[23].mxu1 }
 0x512   :  { %v2014_v47 = vpop.f32.mrb[24].mxu1 }
 0x513   :  { %v1514_v42 = vpop.f32.mrb[25].mxu1 }
 0x516   :  { %v2017_v48 = vpop.f32.mrb[26].mxu1 }
 0x517   :  { %v1524_v43 = vpop.f32.mrb[27].mxu1 }
 0x51a   :  { %v2020_v51 = vpop.f32.mrb[28].mxu1 }
 0x51b   :  { %v1534_v52 = vpop.f32.mrb[29].mxu1 }
 0x571   :  { %v1997_v10 = vpop.f32.mrb[24].mxu0 }
 0x572   :  { %v2507_v53 = vadd.f32 %v2011_v45, %v1997_v10  ;;  %v1396_v54 = vpop.f32.mrb[25].mxu0 }
 0x573   :  { %v2509_v49 = vadd.f32 %v1504_v46, %v1396_v54 }
 0x574   :  { %v1544_v55 = vsel %vm50_vm0, %v2507_v53, 0.0  ;;  %v1566_v50 = vmul.f32 %v2507_v53, %v2507_v53 }
 0x575   :  { %v1543_v57 = vsel %vm50_vm0, %v2509_v49, 0.0  ;;  %v1565_v56 = vmul.f32 %v2509_v49, %v2509_v49 }
 0x576   :  { %v1574_v58 = vsel %vm50_vm0, %v1566_v50, 0.0  ;;  %v1545_v59 = vadd.f32 %v1544_v55, %v1543_v57 }
 0x577   :  { %v1573_v60 = vsel %vm50_vm0, %v1565_v56, 0.0 }
 0x578   :  { %v1575_v61 = vadd.f32 %v1574_v58, %v1573_v60 }
 0x57c   :  { %v2000_v62 = vpop.f32.mrb[26].mxu0 }
 0x57d   :  { %v2521_v63 = vadd.f32 %v2014_v47, %v2000_v62  ;;  %v1406_v0 = vpop.f32.mrb[27].mxu0 }
 0x57e   :  { %v2523_v1 = vadd.f32 %v1514_v42, %v1406_v0 }
 0x57f   :  { %v1568_v2 = vmul.f32 %v2521_v63, %v2521_v63  ;;  %v1548_v6 = vsel %vm50_vm0, %v2521_v63, 0.0 }
 0x580   :  { %v1546_v3 = vsel %vm50_vm0, %v2523_v1, 0.0  ;;  %v1567_v4 = vmul.f32 %v2523_v1, %v2523_v1 }
 0x581   :  { %v1547_v5 = vadd.f32 %v1546_v3, %v1545_v59  ;;  %v1578_v11 = vsel %vm50_vm0, %v1568_v2, 0.0 }
 0x582   :  { %v1576_v7 = vsel %vm50_vm0, %v1567_v4, 0.0 }
 0x583   :  { %v1577_v8 = vadd.f32 %v1576_v7, %v1575_v61  ;;  %v1549_v9 = vadd.f32 %v1548_v6, %v1547_v5  ;;  %v1617_v7 = vsub.s32 1, %v2296_v20 }
 0x584   :  { %v2003_v12 = vpop.f32.mrb[28].mxu0 }
 0x585   :  { %v2535_v33 = vadd.f32 %v2017_v48, %v2003_v12  ;;  %v1416_v13 = vpop.f32.mrb[29].mxu0  ;;  %v1579_v14 = vadd.f32 %v1578_v11, %v1577_v8  ;;  %v1629_v8 = vsub.s32 2, %v2296_v20 }
 0x586   :  { %v1525_v15 = vadd.f32 %v1524_v43, %v1416_v13 }
 0x587   :  { %v1570_v16 = vmul.f32 %v2535_v33, %v2535_v33  ;;  %v1552_v21 = vsel %vm50_vm0, %v2535_v33, 0.0 }
 0x588   :  { %v1550_v17 = vsel %vm50_vm0, %v1525_v15, 0.0  ;;  %v1569_v18 = vmul.f32 %v1525_v15, %v1525_v15 }
 0x589   :  { %v1551_v19 = vadd.f32 %v1550_v17, %v1549_v9  ;;  %v1582_v25 = vsel %vm50_vm0, %v1570_v16, 0.0 }
 0x58a   :  { %v1580_v22 = vsel %vm50_vm0, %v1569_v18, 0.0 }
 0x58b   :  { %v1581_v23 = vadd.f32 %v1580_v22, %v1579_v14  ;;  %v1553_v24 = vadd.f32 %v1552_v21, %v1551_v19 }
 0x58c   :  { %v2006_v29 = vpop.f32.mrb[30].mxu0 }
 0x58d   :  { %v1540_v31 = vadd.f32 %v2020_v51, %v2006_v29  ;;  %v1426_v32 = vpop.f32.mrb[31].mxu0  ;;  %v1583_v30 = vadd.f32 %v1582_v25, %v1581_v23 }
 0x58e   :  { %v1535_v34 = vadd.f32 %v1534_v52, %v1426_v32 }
 0x58f   :  { %v1572_v37 = vmul.f32 %v1540_v31, %v1540_v31  ;;  %v1556_v27 = vsel %vm50_vm0, %v1540_v31, 0.0 }
 0x590   :  { %v1554_v38 = vsel %vm50_vm0, %v1535_v34, 0.0  ;;  %v1571_v39 = vmul.f32 %v1535_v34, %v1535_v34 }
 0x591   :  { %v1555_v40 = vadd.f32 %v1554_v38, %v1553_v24  ;;  %v1586_v35 = vsel %vm50_vm0, %v1572_v37, 0.0  ;;  %v2166_v37 = vld [vmem:[%s2616_s0] sm:$0xff] }
 0x592   :  { %v1584_v28 = vsel %vm50_vm0, %v1571_v39, 0.0  ;;  %v2167_v39 = vld [vmem:[%s2616_s0 + $0x8] sm:$0xff] }
 0x593   :  { %v1557_v41 = vadd.f32 %v1556_v27, %v1555_v40  ;;  %v1585_v44 = vadd.f32 %v1584_v28, %v1583_v30  ;;  %v2168_v27 = vld [vmem:[%s2616_s0 + $0x10] sm:$0xff] }
 0x595   :  { %v1558_v36 = vrot.slane %v1557_v41, 4  ;;  %v1587_v45 = vadd.f32 %v1586_v35, %v1585_v44  ;;  %v2170_v35 = vld [vmem:[%s2616_s0 + $0x20] sm:$0xff] }
 0x597   :  { %v1559_v46 = vadd.f32 %v1558_v36, %v1557_v41  ;;  %v1588_v47 = vrot.slane %v1587_v45, 4  ;;  %v2169_v41 = vld [vmem:[%s2616_s0 + $0x18] sm:$0xff] }
 0x599   :  { %v1560_v42 = vrot.slane %v1559_v46, 2  ;;  %v1589_v48 = vadd.f32 %v1588_v47, %v1587_v45  ;;  %v2171_v45 = vld [vmem:[%s2616_s0 + $0x28] sm:$0xff]  ;;  %v2172_v47 = vld [vmem:[%s2616_s0 + $0x30] sm:$0xff] }
 0x59b   :  { %v1561_v43 = vadd.f32 %v1560_v42, %v1559_v46  ;;  %v1590_v51 = vrot.slane %v1589_v48, 2 }
 0x59d   :  { %v1562_v52 = vrot.slane %v1561_v43, 1  ;;  %v1591_v10 = vadd.f32 %v1590_v51, %v1589_v48  ;;  %v2173_v48 = vld [vmem:[%s2616_s0 + $0x38] sm:$0xff] }
 0x59f   :  { %v1563_v54 = vadd.f32 %v1562_v52, %v1561_v43  ;;  %v1592_v55 = vrot.slane %v1591_v10, 1 }
 0x5a1   :  { %v1564_v50 = vmul.f32 0.015625, %v1563_v54  ;;  %v1593_v57 = vadd.f32 %v1592_v55, %v1591_v10 }
 0x5a3   :  { %v1594_v56 = vmul.f32 0.015625, %v1593_v57  ;;  %v1595_v58 = vmul.f32 %v1564_v50, %v1564_v50  ;;  %v1597_v59 = vsub.f32 %v2509_v49, %v1564_v50  ;;  %v1598_v60 = vsub.f32 %v2507_v53, %v1564_v50 }
 0x5a4   :  { %v1599_v61 = vsub.f32 %v2523_v1, %v1564_v50  ;;  %v1600_v62 = vsub.f32 %v2521_v63, %v1564_v50  ;;  %v1601_v0 = vsub.f32 %v1525_v15, %v1564_v50  ;;  %v1602_v2 = vsub.f32 %v2535_v33, %v1564_v50 }
 0x5a5   :  { %v1596_v3 = vsub.f32 %v1594_v56, %v1595_v58  ;;  %v1603_v4 = vsub.f32 %v1535_v34, %v1564_v50  ;;  %v1604_v5 = vsub.f32 %v1540_v31, %v1564_v50  ;;  %v1618_v49 = vrot.slane %v2470_v26, %v1617_v7 }
 0x5a6   :  { %v1630_v53 = vrot.slane %v2470_v26, %v1629_v8 }
 0x5a7   :  { %v1605_v6 = vadd.f32 1e-05, %v1596_v3 }
 0x5a9   :  { %2164 = vrsqrt.f32 %v1605_v6 }
 0x5b3   :  { %v2165_v9 = vpop.eup %2164 }
 0x5b4   :  { %v1607_v1 = vmul.f32 %v2165_v9, %v1597_v59  ;;  %v1608_v11 = vmul.f32 %v2165_v9, %v1598_v60  ;;  %v1609_v63 = vmul.f32 %v2165_v9, %v1599_v61  ;;  %v1610_v12 = vmul.f32 %v2165_v9, %v1600_v62 }
 0x5b5   :  { %v1611_v13 = vmul.f32 %v2165_v9, %v1601_v0  ;;  %v1612_v33 = vmul.f32 %v2165_v9, %v1602_v2  ;;  %v1613_v14 = vmul.f32 %v2165_v9, %v1603_v4  ;;  %v1614_v15 = vmul.f32 %v2165_v9, %v1604_v5 }
 0x5b6   :  { %v1619_v16 = vmul.f32 %v1618_v49, %v1607_v1  ;;  %v1620_v17 = vmul.f32 %v1618_v49, %v1608_v11  ;;  %v1621_v18 = vmul.f32 %v1618_v49, %v1609_v63  ;;  %v1622_v19 = vmul.f32 %v1618_v49, %v1610_v12 }
 0x5b7   :  { %v1623_v21 = vmul.f32 %v1618_v49, %v1611_v13  ;;  %v1624_v22 = vmul.f32 %v1618_v49, %v1612_v33  ;;  %v1625_v20 = vmul.f32 %v1618_v49, %v1613_v14  ;;  %v1626_v23 = vmul.f32 %v1618_v49, %v1614_v15 }
 0x5b8   :  { %v1631_v24 = vadd.f32 %v1630_v53, %v1619_v16  ;;  %v1632_v25 = vadd.f32 %v1630_v53, %v1620_v17  ;;  %v1633_v29 = vadd.f32 %v1630_v53, %v1621_v18  ;;  %v1634_v26 = vadd.f32 %v1630_v53, %v1622_v19 }
 0x5b9   :  { %v1635_v31 = vadd.f32 %v1630_v53, %v1623_v21  ;;  %v1636_v32 = vadd.f32 %v1630_v53, %v1624_v22  ;;  %v1637_v30 = vadd.f32 %v1630_v53, %v1625_v20  ;;  %v1638_v34 = vadd.f32 %v1630_v53, %v1626_v23 }
 0x5ba   :  { %v1639_v38 = vadd.f32 %v2166_v37, %v1631_v24  ;;  %v1640_v40 = vadd.f32 %v2167_v39, %v1632_v25  ;;  %v1641_v28 = vadd.f32 %v2168_v27, %v1633_v29  ;;  %v1642_v44 = vadd.f32 %v2169_v41, %v1634_v26 }
 0x5bb   :  { %v1643_v36 = vadd.f32 %v2170_v35, %v1635_v31  ;;  %v1644_v46 = vadd.f32 %v2171_v45, %v1636_v32  ;;  %v1645_v42 = vadd.f32 %v2172_v47, %v1637_v30  ;;  %v1646_v43 = vadd.f32 %v2173_v48, %v1638_v34 }
 0x5bc   :  { %1647 = vst.msk [vmem:[%s2620_s7] sm:$0xff] %vm50_vm0, %v1639_v38  ;;  %1648 = vst.msk [vmem:[%s2620_s7 + $0x8] sm:$0xff] %vm50_vm0, %v1640_v40 }
 0x5bd   :  { %1649 = vst.msk [vmem:[%s2620_s7 + $0x10] sm:$0xff] %vm50_vm0, %v1641_v28  ;;  %1650 = vst.msk [vmem:[%s2620_s7 + $0x18] sm:$0xff] %vm50_vm0, %v1642_v44 }
 0x5be   :  { %1651 = vst.msk [vmem:[%s2620_s7 + $0x20] sm:$0xff] %vm50_vm0, %v1643_v36  ;;  %1652 = vst.msk [vmem:[%s2620_s7 + $0x28] sm:$0xff] %vm50_vm0, %v1644_v46 }
 0x5bf   :  { %1653 = vst.msk [vmem:[%s2620_s7 + $0x30] sm:$0xff] %vm50_vm0, %v1645_v42  ;;  %1654 = vst.msk [vmem:[%s2620_s7 + $0x38] sm:$0xff] %vm50_vm0, %v1646_v43 }

</bundles_post_ra>
